<compile_context>
chip_gen: v6e
topology: v6e:2x2x1
jax: 0.10.0
libtpu: 0.0.40
codegen_flags: <defaults>
</compile_context>

<pallas_src>
import jax
import jax.numpy as jnp
from jax.experimental import pallas as pl
from jax.experimental.pallas import tpu as pltpu

_TB_MAX = 1024          # batch rows per tile (multiple of 8; review: 512-1024)


def _round_up(x, m):
    return (x + m - 1) // m * m


# ---------------------------------------------------------------------------
# Kernel factory: fused Linear -> ReLU -> Linear -> ReLU on one batch tile.
# For n_mod > 1 the grid is (modality, batch_tile): pl.program_id(0) selects
# which modality's input block feeds the MXU this step.
# ---------------------------------------------------------------------------
def _make_kernel(n_mod):
    def kernel(*refs):
        x_refs = refs[:n_mod]
        w1_ref, b1_ref, w2_ref, b2_ref, o_ref = refs[n_mod:]

        def compute(x_ref):
            x = x_ref[...].astype(jnp.bfloat16)              # bf16 MXU operand
            h = jnp.dot(x, w1_ref[...], preferred_element_type=jnp.float32)
            h = jnp.maximum(h + b1_ref[...], 0.0)            # bias + ReLU in f32
            o = jnp.dot(h.astype(jnp.bfloat16), w2_ref[...],
                        preferred_element_type=jnp.float32)
            o = jnp.maximum(o + b2_ref[...], 0.0)
            o_ref[...] = o.astype(o_ref.dtype)

        if n_mod == 1:
            compute(x_refs[0])
        else:
            m = pl.program_id(0)
            for j, x_ref in enumerate(x_refs):
                @pl.when(m == j)
                def _(x_ref=x_ref):
                    compute(x_ref)

    return kernel


def _cost(n_rows, D, H, O, in_itemsize):
    return pl.CostEstimate(
        flops=2 * n_rows * (D * H + H * O),
        transcendentals=0,
        bytes_accessed=(n_rows * D * in_itemsize        # activations in
                        + (D * H + H * O) * 2           # bf16 weights
                        + (H + O) * 4                   # f32 biases
                        + n_rows * O * 4),              # f32 output
    )


# ---------------------------------------------------------------------------
# Copy-free path: all modalities share shape (B_i, D) with B_i % 8 == 0.
# No XLA concatenate: each modality is its own pallas_call input.
# ---------------------------------------------------------------------------
def _fusion_mlp_multi(xs, w1, b1, w2, b2):
    n_mod = len(xs)
    B_i, D = xs[0].shape
    H = w1.shape[1]
    O = w2.shape[1]

    # Largest tile (multiple of 8, <= _TB_MAX) that divides the per-modality
    # batch; force >=2 total grid steps when there is enough work (v7x 2 TCs).
    target_tiles = pl.cdiv(B_i, _TB_MAX)
    if n_mod == 1 and target_tiles == 1 and B_i >= 16:
        target_tiles = 2
    tb = max(8, (B_i // target_tiles) // 8 * 8)
    while B_i % tb:
        tb -= 8
    n_tiles = B_i // tb
    n_rows = n_mod * B_i

    def x_map(j):
        # Inactive modalities pin their block index -> no redundant re-DMA.
        return lambda m, i: (jnp.where(m == j, i, 0), 0)

    in_specs = [pl.BlockSpec((tb, D), x_map(j)) for j in range(n_mod)]
    in_specs += [
        pl.BlockSpec((D, H), lambda m, i: (0, 0)),   # W1: VMEM-resident
        pl.BlockSpec((1, H), lambda m, i: (0, 0)),   # b1: VMEM-resident
        pl.BlockSpec((H, O), lambda m, i: (0, 0)),   # W2: VMEM-resident
        pl.BlockSpec((1, O), lambda m, i: (0, 0)),   # b2: VMEM-resident
    ]

    return pl.pallas_call(
        _make_kernel(n_mod),
        out_shape=jax.ShapeDtypeStruct((n_rows, O), jnp.float32),
        grid=(n_mod, n_tiles),
        in_specs=in_specs,
        out_specs=pl.BlockSpec((tb, O), lambda m, i: (m * n_tiles + i, 0)),
        compiler_params=pltpu.CompilerParams(
            dimension_semantics=("parallel", "parallel")),
        cost_estimate=_cost(n_rows, D, H, O, jnp.dtype(xs[0].dtype).itemsize),
    )(*xs, w1, b1, w2, b2)


# ---------------------------------------------------------------------------
# Fallback path (ragged per-modality batches): XLA row-stack, then tiled MLP.
# Near-divisor tiling keeps padding waste < 8 rows per tile.
# ---------------------------------------------------------------------------
def _fusion_mlp_concat(x, w1, b1, w2, b2):
    B, D = x.shape
    H = w1.shape[1]
    O = w2.shape[1]

    n_tiles = pl.cdiv(B, _TB_MAX)
    if n_tiles == 1 and B >= 16:
        n_tiles = 2                              # keep both v7x TCs busy
    tb = _round_up(pl.cdiv(B, n_tiles), 8)
    Bp = tb * n_tiles
    if Bp != B:
        x = jnp.pad(x, ((0, Bp - B), (0, 0)))    # padded rows sliced off below

    out = pl.pallas_call(
        _make_kernel(1),
        out_shape=jax.ShapeDtypeStruct((Bp, O), jnp.float32),
        grid=(n_tiles,),
        in_specs=[
            pl.BlockSpec((tb, D), lambda i: (i, 0)),
            pl.BlockSpec((D, H), lambda i: (0, 0)),
            pl.BlockSpec((1, H), lambda i: (0, 0)),
            pl.BlockSpec((H, O), lambda i: (0, 0)),
            pl.BlockSpec((1, O), lambda i: (0, 0)),
        ],
        out_specs=pl.BlockSpec((tb, O), lambda i: (i, 0)),
        compiler_params=pltpu.CompilerParams(
            dimension_semantics=("parallel",)),
        cost_estimate=_cost(Bp, D, H, O, jnp.dtype(x.dtype).itemsize),
    )(x, w1, b1, w2, b2)
    return out[:B] if Bp != B else out


def concat_fusion(params, *xs):
    """Forward pass of ConcatFusion: cat(dim=0) then fused bf16 MLP kernel."""
    w1 = params["w1"].astype(jnp.bfloat16)       # bf16 MXU weights (cast once)
    w2 = params["w2"].astype(jnp.bfloat16)
    b1 = params["b1"].astype(jnp.float32)
    b2 = params["b2"].astype(jnp.float32)

    same_shape = all(x.shape == xs[0].shape and x.dtype == xs[0].dtype
                     for x in xs)
    if same_shape and xs[0].shape[0] % 8 == 0:
        # Copy-free: modalities are fed straight into the kernel (no concat).
        return _fusion_mlp_multi(list(xs), w1, b1, w2, b2)
    # General (ragged) case: row-stack once, then the same fused kernel.
    x = jnp.concatenate(xs, axis=0) if len(xs) > 1 else xs[0]
    return _fusion_mlp_concat(x, w1, b1, w2, b2)


# ---------------------------------------------------------------------------
# Deterministic parameter init (PyTorch nn.Linear default: U(+-1/sqrt(fan_in)))
# Weights stored pre-transposed as [in_features, out_features].
# ---------------------------------------------------------------------------
def init_params(key, dims, hidden_size, output_size, dtype=jnp.float32):
    dsum = sum(dims)
    k1, k2, k3, k4 = jax.random.split(key, 4)
    s1 = 1.0 / (dsum ** 0.5)
    s2 = 1.0 / (hidden_size ** 0.5)
    return {
        "w1": jax.random.uniform(k1, (dsum, hidden_size), dtype, -s1, s1),
        "b1": jax.random.uniform(k2, (1, hidden_size), dtype, -s1, s1),
        "w2": jax.random.uniform(k3, (hidden_size, output_size), dtype, -s2, s2),
        "b2": jax.random.uniform(k4, (1, output_size), dtype, -s2, s2),
    }


def reference_forward_f32(params, *xs):
    """Pure-JAX f32 reference of the PyTorch forward."""
    c = jnp.concatenate(xs, axis=0) if len(xs) > 1 else xs[0]
    h = jnp.maximum(c @ params["w1"] + params["b1"], 0.0)
    return jnp.maximum(h @ params["w2"] + params["b2"], 0.0)


def reference_forward_bf16(params, *xs):
    """Reference that mirrors the kernel's bf16-GEMM / f32-accumulate math."""
    c = jnp.concatenate(xs, axis=0) if len(xs) > 1 else xs[0]
    w1 = params["w1"].astype(jnp.bfloat16)
    w2 = params["w2"].astype(jnp.bfloat16)
    h = jnp.dot(c.astype(jnp.bfloat16), w1, preferred_element_type=jnp.float32)
    h = jnp.maximum(h + params["b1"], 0.0)
    o = jnp.dot(h.astype(jnp.bfloat16), w2, preferred_element_type=jnp.float32)
    return jnp.maximum(o + params["b2"], 0.0)


# ---------------------------------------------------------------------------
if __name__ == "__main__":
    # Two modalities, each with feature dim sum(dims)=128 (lane-dense),
    # hidden/output = 256 (module defaults, lane-dense outputs).
    dims = [64, 64]
    hidden_size = 256
    output_size = 256

    key = jax.random.PRNGKey(0)
    key, kp = jax.random.split(key)
    params = init_params(kp, dims, hidden_size, output_size)

    # --- main case: equal-sized modalities -> copy-free multi-input path ---
    xs = []
    for _ in range(2):
        key, ki = jax.random.split(key)
        xs.append(jax.random.normal(ki, (8, sum(dims)), jnp.float32))

    out = jax.block_until_ready(concat_fusion(params, *xs))
    assert out.shape == (16, output_size)
    assert jnp.allclose(out, reference_forward_bf16(params, *xs),
                        rtol=1e-2, atol=1e-2), "mismatch vs bf16 reference"
    assert jnp.allclose(out, reference_forward_f32(params, *xs),
                        rtol=5e-2, atol=5e-2), "mismatch vs f32 reference"

    # --- ragged case: unequal batch sizes exercise the concat fallback path ---
    key, ka, kb = jax.random.split(key, 3)
    ys = [jax.random.normal(ka, (12, sum(dims)), jnp.float32),
          jax.random.normal(kb, (8, sum(dims)), jnp.float32)]
    out2 = jax.block_until_ready(concat_fusion(params, *ys))
    assert out2.shape == (20, output_size)
    assert jnp.allclose(out2, reference_forward_bf16(params, *ys),
                        rtol=1e-2, atol=1e-2), "mismatch (ragged) vs bf16 ref"

    print("KERNEL_OK")
</pallas_src>

<mosaic_0001>
module attributes {stable_mosaic.version = 11 : i64} {
  func.func @kernel(%arg0: i32, %arg1: i32, %arg2: memref<8x128xf32, #tpu.memory_space<vmem>>, %arg3: memref<8x128xf32, #tpu.memory_space<vmem>>, %arg4: memref<128x256xbf16, #tpu.memory_space<vmem>>, %arg5: memref<1x256xf32, #tpu.memory_space<vmem>>, %arg6: memref<256x256xbf16, #tpu.memory_space<vmem>>, %arg7: memref<1x256xf32, #tpu.memory_space<vmem>>, %arg8: memref<8x256xf32, #tpu.memory_space<vmem>>) attributes {dimension_semantics = [#tpu.dimension_semantics<parallel>, #tpu.dimension_semantics<parallel>], iteration_bounds = array<i64: 2, 1>, scalar_prefetch = 0 : i64, scratch_operands = 0 : i64, tpu.core_type = #tpu.core_type<tc>, window_params = [{transform_indices = @transform_0, window_bounds = array<i64: 8, 128>}, {transform_indices = @transform_1, window_bounds = array<i64: 8, 128>}, {pipeline_mode = #tpu.pipeline_mode<synchronous>, transform_indices = @transform_2, window_bounds = array<i64: 128, 256>}, {pipeline_mode = #tpu.pipeline_mode<synchronous>, transform_indices = @transform_3, window_bounds = array<i64: 1, 256>}, {pipeline_mode = #tpu.pipeline_mode<synchronous>, transform_indices = @transform_4, window_bounds = array<i64: 256, 256>}, {pipeline_mode = #tpu.pipeline_mode<synchronous>, transform_indices = @transform_5, window_bounds = array<i64: 1, 256>}, {transform_indices = @transform_6, window_bounds = array<i64: 8, 256>}]} {
    %c0_i32 = arith.constant 0 : i32
    %0 = arith.cmpi eq, %arg0, %c0_i32 : i32
    %1 = arith.extui %0 : i1 to i32
    %c0_i32_0 = arith.constant 0 : i32
    %2 = arith.cmpi ne, %1, %c0_i32_0 : i32
    scf.if %2 {
      %c0 = arith.constant 0 : index
      %c0_2 = arith.constant 0 : index
      %6 = vector.load %arg2[%c0, %c0_2] : memref<8x128xf32, #tpu.memory_space<vmem>>, vector<8x128xf32>
      %7 = arith.truncf %6 : vector<8x128xf32> to vector<8x128xbf16>
      %c0_3 = arith.constant 0 : index
      %c0_4 = arith.constant 0 : index
      %8 = vector.load %arg4[%c0_3, %c0_4] : memref<128x256xbf16, #tpu.memory_space<vmem>>, vector<128x256xbf16>
      %cst = arith.constant dense<0.000000e+00> : vector<8x256xf32>
      %9 = tpu.matmul %7, %8, %cst {dimension_numbers = #tpu.dot_dimension_numbers<[1], [0], [0], [1], [0, 0, 1, 1], [], []>} : vector<8x128xbf16>, vector<128x256xbf16>, vector<8x256xf32> -> vector<8x256xf32>
      %c0_5 = arith.constant 0 : index
      %c0_6 = arith.constant 0 : index
      %10 = vector.load %arg5[%c0_5, %c0_6] : memref<1x256xf32, #tpu.memory_space<vmem>>, vector<1x256xf32>
      %11 = vector.broadcast %10 : vector<1x256xf32> to vector<8x256xf32>
      %12 = arith.addf %9, %11 : vector<8x256xf32>
      %cst_7 = arith.constant 0.000000e+00 : f32
      %13 = vector.broadcast %cst_7 : f32 to vector<8x256xf32>
      %14 = arith.maximumf %12, %13 : vector<8x256xf32>
      %15 = arith.truncf %14 : vector<8x256xf32> to vector<8x256xbf16>
      %c0_8 = arith.constant 0 : index
      %c0_9 = arith.constant 0 : index
      %16 = vector.load %arg6[%c0_8, %c0_9] : memref<256x256xbf16, #tpu.memory_space<vmem>>, vector<256x256xbf16>
      %cst_10 = arith.constant dense<0.000000e+00> : vector<8x256xf32>
      %17 = tpu.matmul %15, %16, %cst_10 {dimension_numbers = #tpu.dot_dimension_numbers<[1], [0], [0], [1], [0, 0, 1, 1], [], []>} : vector<8x256xbf16>, vector<256x256xbf16>, vector<8x256xf32> -> vector<8x256xf32>
      %c0_11 = arith.constant 0 : index
      %c0_12 = arith.constant 0 : index
      %18 = vector.load %arg7[%c0_11, %c0_12] : memref<1x256xf32, #tpu.memory_space<vmem>>, vector<1x256xf32>
      %19 = vector.broadcast %18 : vector<1x256xf32> to vector<8x256xf32>
      %20 = arith.addf %17, %19 : vector<8x256xf32>
      %cst_13 = arith.constant 0.000000e+00 : f32
      %21 = vector.broadcast %cst_13 : f32 to vector<8x256xf32>
      %22 = arith.maximumf %20, %21 : vector<8x256xf32>
      %c0_14 = arith.constant 0 : index
      %c0_15 = arith.constant 0 : index
      %23 = vector.load %arg8[%c0_14, %c0_15] : memref<8x256xf32, #tpu.memory_space<vmem>>, vector<8x256xf32>
      tpu.vector_store %arg8[%c0_14, %c0_15], %22 {strides = array<i32>} : memref<8x256xf32, #tpu.memory_space<vmem>>, vector<8x256xf32>,
    } else {
    }
    %c1_i32 = arith.constant 1 : i32
    %3 = arith.cmpi eq, %arg0, %c1_i32 : i32
    %4 = arith.extui %3 : i1 to i32
    %c0_i32_1 = arith.constant 0 : i32
    %5 = arith.cmpi ne, %4, %c0_i32_1 : i32
    scf.if %5 {
      %c0 = arith.constant 0 : index
      %c0_2 = arith.constant 0 : index
      %6 = vector.load %arg3[%c0, %c0_2] : memref<8x128xf32, #tpu.memory_space<vmem>>, vector<8x128xf32>
      %7 = arith.truncf %6 : vector<8x128xf32> to vector<8x128xbf16>
      %c0_3 = arith.constant 0 : index
      %c0_4 = arith.constant 0 : index
      %8 = vector.load %arg4[%c0_3, %c0_4] : memref<128x256xbf16, #tpu.memory_space<vmem>>, vector<128x256xbf16>
      %cst = arith.constant dense<0.000000e+00> : vector<8x256xf32>
      %9 = tpu.matmul %7, %8, %cst {dimension_numbers = #tpu.dot_dimension_numbers<[1], [0], [0], [1], [0, 0, 1, 1], [], []>} : vector<8x128xbf16>, vector<128x256xbf16>, vector<8x256xf32> -> vector<8x256xf32>
      %c0_5 = arith.constant 0 : index
      %c0_6 = arith.constant 0 : index
      %10 = vector.load %arg5[%c0_5, %c0_6] : memref<1x256xf32, #tpu.memory_space<vmem>>, vector<1x256xf32>
      %11 = vector.broadcast %10 : vector<1x256xf32> to vector<8x256xf32>
      %12 = arith.addf %9, %11 : vector<8x256xf32>
      %cst_7 = arith.constant 0.000000e+00 : f32
      %13 = vector.broadcast %cst_7 : f32 to vector<8x256xf32>
      %14 = arith.maximumf %12, %13 : vector<8x256xf32>
      %15 = arith.truncf %14 : vector<8x256xf32> to vector<8x256xbf16>
      %c0_8 = arith.constant 0 : index
      %c0_9 = arith.constant 0 : index
      %16 = vector.load %arg6[%c0_8, %c0_9] : memref<256x256xbf16, #tpu.memory_space<vmem>>, vector<256x256xbf16>
      %cst_10 = arith.constant dense<0.000000e+00> : vector<8x256xf32>
      %17 = tpu.matmul %15, %16, %cst_10 {dimension_numbers = #tpu.dot_dimension_numbers<[1], [0], [0], [1], [0, 0, 1, 1], [], []>} : vector<8x256xbf16>, vector<256x256xbf16>, vector<8x256xf32> -> vector<8x256xf32>
      %c0_11 = arith.constant 0 : index
      %c0_12 = arith.constant 0 : index
      %18 = vector.load %arg7[%c0_11, %c0_12] : memref<1x256xf32, #tpu.memory_space<vmem>>, vector<1x256xf32>
      %19 = vector.broadcast %18 : vector<1x256xf32> to vector<8x256xf32>
      %20 = arith.addf %17, %19 : vector<8x256xf32>
      %cst_13 = arith.constant 0.000000e+00 : f32
      %21 = vector.broadcast %cst_13 : f32 to vector<8x256xf32>
      %22 = arith.maximumf %20, %21 : vector<8x256xf32>
      %c0_14 = arith.constant 0 : index
      %c0_15 = arith.constant 0 : index
      %23 = vector.load %arg8[%c0_14, %c0_15] : memref<8x256xf32, #tpu.memory_space<vmem>>, vector<8x256xf32>
      tpu.vector_store %arg8[%c0_14, %c0_15], %22 {strides = array<i32>} : memref<8x256xf32, #tpu.memory_space<vmem>>, vector<8x256xf32>,
    } else {
    }
    return
  }
  func.func @transform_0(%arg0: i32, %arg1: i32) -> (i32, i32) {
    %c0_i32 = arith.constant 0 : i32
    %0 = arith.cmpi eq, %arg0, %c0_i32 : i32
    %c0_i32_0 = arith.constant 0 : i32
    %1 = arith.select %0, %arg1, %c0_i32_0 : i32
    %c0_i32_1 = arith.constant 0 : i32
    %c0_i32_2 = arith.constant 0 : i32
    return %1, %c0_i32_1 : i32, i32
  }
  func.func @transform_1(%arg0: i32, %arg1: i32) -> (i32, i32) {
    %c1_i32 = arith.constant 1 : i32
    %0 = arith.cmpi eq, %arg0, %c1_i32 : i32
    %c0_i32 = arith.constant 0 : i32
    %1 = arith.select %0, %arg1, %c0_i32 : i32
    %c0_i32_0 = arith.constant 0 : i32
    %c0_i32_1 = arith.constant 0 : i32
    return %1, %c0_i32_0 : i32, i32
  }
  func.func @transform_2(%arg0: i32, %arg1: i32) -> (i32, i32) {
    %c0_i32 = arith.constant 0 : i32
    %c0_i32_0 = arith.constant 0 : i32
    %c0_i32_1 = arith.constant 0 : i32
    return %c0_i32, %c0_i32_0 : i32, i32
  }
  func.func @transform_3(%arg0: i32, %arg1: i32) -> (i32, i32) {
    %c0_i32 = arith.constant 0 : i32
    %c0_i32_0 = arith.constant 0 : i32
    %c0_i32_1 = arith.constant 0 : i32
    return %c0_i32, %c0_i32_0 : i32, i32
  }
  func.func @transform_4(%arg0: i32, %arg1: i32) -> (i32, i32) {
    %c0_i32 = arith.constant 0 : i32
    %c0_i32_0 = arith.constant 0 : i32
    %c0_i32_1 = arith.constant 0 : i32
    return %c0_i32, %c0_i32_0 : i32, i32
  }
  func.func @transform_5(%arg0: i32, %arg1: i32) -> (i32, i32) {
    %c0_i32 = arith.constant 0 : i32
    %c0_i32_0 = arith.constant 0 : i32
    %c0_i32_1 = arith.constant 0 : i32
    return %c0_i32, %c0_i32_0 : i32, i32
  }
  func.func @transform_6(%arg0: i32, %arg1: i32) -> (i32, i32) {
    %c1_i32 = arith.constant 1 : i32
    %0 = arith.muli %arg0, %c1_i32 : i32
    %1 = arith.addi %0, %arg1 : i32
    %c0_i32 = arith.constant 0 : i32
    %c0_i32_0 = arith.constant 0 : i32
    return %1, %c0_i32 : i32, i32
  }
}

</mosaic_0001>

<bundles_post_ra>
// kernel: tpu_custom_call.1
= control target key start
LH: loop header
LB: loop body
LE: loop exit
PB: predicated region body
PF: predicated region fallthrough
CT: control target
= control target key end

     0   :  { %11 = vsyncpa [#allocation3], 0  ;;  %s2125_s0 = inlined_call_operand.hbm [shape: f32[8,128], index: 0, kind: input, shape index: {}]   ;;  %s2126_s1 = inlined_call_operand.hbm [shape: f32[8,128], index: 1, kind: input, shape index: {}]   ;;  %s2127_s2 = inlined_call_operand.hbm [shape: bf16[128,256], index: 2, kind: input, shape index: {}]   ;;  %s2128_s3 = inlined_call_operand.vmem [shape: f32[1,256], index: 3, kind: input, shape index: {}]   ;;  %s2129_s4 = inlined_call_operand.hbm [shape: bf16[256,256], index: 4, kind: input, shape index: {}]   ;;  %s2130_s5 = inlined_call_operand.vmem [shape: f32[1,256], index: 5, kind: input, shape index: {}]   ;;  %s2131_s6 = inlined_call_operand.hbm [shape: f32[16,256], index: 6, kind: output, shape index: {}]  }
   0x1   :  { %13 = vsyncpa [#allocation3 + $0x1], 0 }
   0x2   :  { %14 = vsyncpa [#allocation6], 0 }
   0x3   :  { %16 = vsyncpa [#allocation6 + $0x1], 0 }
   0x4   :  { %17 = vsyncpa [#allocation9], 0 }
   0x5   :  { %18 = vsyncpa [#allocation4], 0 }
   0x6   :  { %20 = vsyncpa [#allocation4 + $0x1], 0  ;;  %s1924_s21 = smov 0   ;;  %s1926_s22 = smov 0  }
   0x7   :  { %s1928_s23 = smov 0   ;;  %s1930_s24 = smov 0  }
   0x8   :  { %s1932_s25 = smov 0   ;;  %s1934_s26 = smov 0  }
   0x9 LB: > { %s1955_s27 = sadd.s32 4294967295, %s1878_s26   ;;  %s1319_s28 = sadd.s32 4294967294, %s1878_s26   ;;  %s1878_s26 = sphi %s1934_s26, %s26_s26   ;;  %s1874_s25 = sphi %s1932_s25, %s2151_s25   ;;  %s1870_s24 = sphi %s1930_s24, %s2150_s24   ;;  %s1866_s23 = sphi %s1928_s23, %s2149_s23   ;;  %s1862_s22 = sphi %s1926_s22, %s2148_s22   ;;  %s1858_s21 = sphi %s1924_s21, %s2147_s21  }
   0xa   : > { %s38_s29 = sadd.s32 1, %s1874_s25  ;;  %s191_s30 = sadd.s32 1, %s1866_s23 }
   0xb   : > { %p40_p0 = scmp.ge.s32.totalorder %s38_s29, 2  ;;  %p201_p1 = scmp.ne.s32.totalorder %s1866_s23, %s1862_s22 }
   0xc   : > { %p202_p2 = scmp.eq.s32.totalorder %s1955_s27, 1  ;;  %p207_p3 = scmp.ne.s32.totalorder %s1862_s22, %s1858_s21 }
   0xd   : > { %s2153_s29 = smov (%p40_p0, %s38_s29), 0  ;;  %p208_p5 = scmp.eq.s32.totalorder %s1319_s28, 1 }
   0xe   : > { %p1967_p4 = por %p202_p2, %p201_p1  ;;  %s188_s8 = ssub.s32 %s1874_s25, %s2153_s29 }
   0xf   : > { %p1320_p6 = scmp.ge.s32.totalorder %s1878_s26, 1  ;;  %p189_p7 = scmp.eq.s32.totalorder %s188_s8, 0 }
  0x10   : > { %p1974_p8 = por %p208_p5, %p207_p3  ;;  %p215_p9 = scmp.lt.s32.totalorder %s1878_s26, 3 }
  0x11   : > { %s1980_s10 = scalar_select %p189_p7, %s1866_s23, %s191_s30  }
  0x12   : > { %p1982_p10 = pnand %p1320_p6, %p215_p9  ;;  %p2132_p11 = scmp.eq.s32.totalorder %s1955_s27, 0 }
  0x13   : > { %s1880_s12 = smov [#allocation7]   ;;  %s1881_s15 = smov [#allocation8]  }
  0x14   : > { %p1454_p12 = pneg %p1982_p10  ;;  %s227_s13 = sshll.u32 %s1880_s12, 4  ;;  %s228_s13 = int_to_ptr.vmem [resolvable:$true] %s227_s13 }
  0x15   : > { %s243_s16 = sshll.u32 %s1881_s15, 4  ;;  %s1693_s17 = scalar_lea.vmem %s228_s13, 2048  ;;  %s244_s16 = int_to_ptr.vmem [resolvable:$true] %s243_s16 }
  0x16   : > { %p1991_p13 = pnand %p2132_p11, %p1454_p12  ;;  %p1694_p2 = scmp.ne.s32.totalorder %s228_s13, %s1693_s17 }
  0x17   : > { %p1701_p6 = scmp.lt.s32.totalorder %s228_s13, %s228_s13  ;;  %p1702_p7 = scmp.lt.s32.totalorder %s1693_s17, %s1693_s17 }
  0x18   : > { %p1684_p1 = pneg %p1991_p13 }
  0x19   : > { %p1703_p9 = por %p1702_p7, %p1701_p6 }
  0x1a   : > { %p1696_p3 = pnand %p1694_p2, %p1684_p1 }
  0x1c   : > { %p1697_p5 = pneg %p1696_p3 }
  0x1e   : > { %p1704_p12 = pnand %p1703_p9, %p1697_p5 }
  0x20   : > { %1707 = shalt.err (!%p1704_p12)
}
  0x21   : > { %s1882_s18 = smov 128   ;;  %s1883_s19 = smov 8  }
  0x22   : > { %1457 = dma.hbm_to_vmem [thread:$0]  (!%p1991_p13), %s2127_s2, 2048, %s228_s13, [#allocation6], %s1882_s18, %s1882_s18, %s1883_s19  }
  0x23   : > { %p1474_p0 = scmp.lt.s32.totalorder %s1878_s26, 2  ;;  %s1719_s30 = scalar_lea.vmem %s244_s16, 4096 }
  0x24   : > { %p1720_p2 = scmp.ne.s32.totalorder %s244_s16, %s1719_s30  ;;  %p1727_p5 = scmp.lt.s32.totalorder %s244_s16, %s244_s16 }
  0x25   : > { %p1728_p7 = scmp.lt.s32.totalorder %s1719_s30, %s1719_s30 }
  0x26   : > { %p1722_p3 = pnand %p1720_p2, %p1684_p1 }
  0x27   : > { %p1729_p9 = por %p1728_p7, %p1727_p5 }
  0x28   : > { %p1723_p6 = pneg %p1722_p3 }
  0x2a   : > { %p1730_p12 = pnand %p1729_p9, %p1723_p6 }
  0x2c   : > { %1733 = shalt.err (!%p1730_p12)
}
  0x2d   : > { %1460 = dma.hbm_to_vmem [thread:$0]  (!%p1991_p13), %s2129_s4, 4096, %s244_s16, [#allocation9], %s1882_s18, %s1882_s18, %s1883_s19  }
  0x2e   : > { %p1475_p11 = scmp.eq.s32.totalorder %s1878_s26, 0  ;;  %s1884_s13 = smov [#allocation2]  }
  0x2f   : > { %s273_s15 = sshll.u32 %s1884_s13, 4  ;;  %s280_s17 = sand.u32 1, %s1878_s26   ;;  %s274_s15 = int_to_ptr.vmem [resolvable:$true] %s273_s15 }
  0x30   : > { %p2019_p1 = pnand %p1475_p11, %p1474_p0  ;;  %s1885_s14 = smov [#allocation5]  }
  0x31   : > { %s293_s28 = sshll.u32 %s1885_s14, 4  ;;  %s1745_s30 = scalar_lea.vmem %s274_s15, 128  ;;  %s294_s28 = int_to_ptr.vmem [resolvable:$true] %s293_s28 }
  0x32   : > { %p1736_p2 = pneg %p2019_p1  ;;  %p1746_p3 = scmp.ne.s32.totalorder %s274_s15, %s1745_s30 }
  0x33   : > { %s1752_s16 = scalar_lea.vmem %s274_s15, 256  ;;  %p1753_p5 = scmp.lt.s32.totalorder %s274_s15, %s274_s15 }
  0x34   : > { %p1748_p13 = pnand %p1746_p3, %p1736_p2  ;;  %p1754_p7 = scmp.lt.s32.totalorder %s1752_s16, %s1745_s30 }
  0x36   : > { %p1749_p6 = pneg %p1748_p13  ;;  %p1755_p9 = por %p1754_p7, %p1753_p5 }
  0x38   : > { %p1756_p11 = pnand %p1755_p9, %p1749_p6 }
  0x3a   : > { %1759 = shalt.err (!%p1756_p11)
}
  0x3b   : > { %1464 = dma.hbm_to_vmem [thread:$0]  (!%p2019_p1), %s2125_s0, 128, %s274_s15, [#allocation3]  }
  0x3c   : > { %s281_s8 = scalar_lea.sflag [#allocation6], %s280_s17  ;;  %s1771_s12 = scalar_lea.vmem %s294_s28, 128 }
  0x3d   : > { %p1772_p0 = scmp.ne.s32.totalorder %s294_s28, %s1771_s12  ;;  %s1778_s13 = scalar_lea.vmem %s294_s28, 256 }
  0x3e   : > { %p1779_p13 = scmp.lt.s32.totalorder %s294_s28, %s294_s28  ;;  %p1780_p5 = scmp.lt.s32.totalorder %s1778_s13, %s1771_s12 }
  0x3f   : > { %p1774_p12 = pnand %p1772_p0, %p1736_p2 }
  0x40   : > { %p1781_p6 = por %p1780_p5, %p1779_p13 }
  0x41   : > { %p1775_p3 = pneg %p1774_p12 }
  0x43   : > { %p1782_p7 = pnand %p1781_p6, %p1775_p3 }
  0x45   : > { %1785 = shalt.err (!%p1782_p7)
}
  0x46   : > { %1467 = dma.hbm_to_vmem [thread:$0]  (!%p2019_p1), %s2126_s1, 128, %s294_s28, %s281_s8  }
  0x47   : > { %302 = sbr.rel (%p1982_p10) target bundleno = 994 (0x3e2), region = 44  ;;  %p2138_p9 = scmp.eq.s32.totalorder (!%p1982_p10), %s1955_s27, 0 }
  0x4c   : > { %1837 = dma.done.wait (%p2138_p9), [#allocation3], 128   ;;  %p2139_p2 = pmov %p2138_p9 }
  0x4d   : > { %s313_s15 = sand.u32 1, %s1955_s27  }
  0x4e   : > { %1839 = vsyncadd (%p2139_p2), [#allocation3], 4294967168  ;;  %s314_s17 = scalar_lea.sflag [#allocation6], %s313_s15  ;;  %p2140_p11 = pmov %p2139_p2 }
  0x4f   : > { %p2141_p0 = pmov %p2139_p2 }
  0x50   : > { %1841 = dma.done.wait (%p2140_p11), %s314_s17, 128  }
  0x51   : > { %1843 = vsyncadd (%p2141_p0), %s314_s17, 4294967168  ;;  %p2142_p1 = pmov %p2141_p0 }
  0x52   : > { %p2143_p10 = pmov %p2141_p0 }
  0x53   : > { %1845 = dma.done.wait (%p2142_p1), [#allocation6], 2048  }
  0x54   : > { %1847 = vsyncadd (%p2143_p10), [#allocation6], 4294965248  ;;  %p2144_p12 = pmov %p2141_p0 }
  0x55   : > { %p2145_p3 = pmov %p2141_p0 }
  0x56   : > { %1849 = dma.done.wait (%p2144_p12), [#allocation9], 4096  }
  0x57   : > { %1851 = vsyncadd (%p2145_p3), [#allocation9], 4294963200  ;;  %s356_s11 = sand.u32 1, %s1862_s22   ;;  %p1332_p13 = scmp.ne.s32.totalorder %s1870_s24, 0 }
  0x58   : > { %s1331_s20 = sshll.u32 %s356_s11, 4 }
  0x59   : > { %s2063_s28 = scalar_lea.vmem [#allocation10], %s1331_s20  ;;  %368 = sbr.rel (%p1332_p13) target bundleno = 529 (0x211), region = 64 }
  0x5e   : > { %v1538_v0 = vld [vmem:[#allocation7 + $0x74] ss:$8 sps:$4 sm:$0xff]   ;;  %v1540_v1 = vld [vmem:[#allocation7 + $0x70] ss:$8 sps:$4 sm:$0xff]   ;;  %v1886_v2 = vmov 0   ;;  %v369_v26 = vld [vmem:[#allocation2] sm:$0xff]  ;;  %v389_v51 = vlaneseq }
  0x5f   : > { %511 = vmatprep.mubr.bf16.mxu0 %v1886_v2  ;;  %479 = vmatprep.subr.bf16.mxu0 %v1538_v0  ;;  %v1541_v3 = vld [vmem:[#allocation7 + $0x64] ss:$8 sps:$4 sm:$0xff]   ;;  %v1543_v4 = vld [vmem:[#allocation7 + $0x60] ss:$8 sps:$4 sm:$0xff]   ;;  %v1544_v5 = vld [vmem:[#allocation7 + $0x54] ss:$8 sps:$4 sm:$0xff]   ;;  %v370_v30 = vpack.c.bf16 %v369_v26, %v369_v26 }
  0x60   : > { %480 = vmatpush1.bf16.msra.mxu0 %v1540_v1  ;;  %v1546_v6 = vld [vmem:[#allocation7 + $0x50] ss:$8 sps:$4 sm:$0xff]   ;;  %v1547_v7 = vld [vmem:[#allocation7 + $0x44] ss:$8 sps:$4 sm:$0xff]   ;;  %v1549_v8 = vld [vmem:[#allocation7 + $0x40] ss:$8 sps:$4 sm:$0xff]  }
  0x61   : > { %481 = vmatprep.subr.bf16.mxu0 %v1541_v3  ;;  %v1550_v9 = vld [vmem:[#allocation7 + $0x34] ss:$8 sps:$4 sm:$0xff]   ;;  %v1564_v11 = vld [vmem:[#allocation8 + $0x70] ss:$8 sps:$4 sm:$0xff]   ;;  %v1565_v12 = vld [vmem:[#allocation8 + $0x64] ss:$8 sps:$4 sm:$0xff]  }
  0x62   : > { %v1562_v10 = vld [vmem:[#allocation8 + $0x74] ss:$8 sps:$4 sm:$0xff]   ;;  %v1552_v13 = vld [vmem:[#allocation7 + $0x30] ss:$8 sps:$4 sm:$0xff]   ;;  %v1567_v14 = vld [vmem:[#allocation8 + $0x60] ss:$8 sps:$4 sm:$0xff]  }
  0x63   : > { %728 = vmatprep.subr.bf16.mxu1 %v1562_v10  ;;  %v1568_v15 = vld [vmem:[#allocation8 + $0x54] ss:$8 sps:$4 sm:$0xff]   ;;  %v1553_v16 = vld [vmem:[#allocation7 + $0x24] ss:$8 sps:$4 sm:$0xff]   ;;  %v1555_v17 = vld [vmem:[#allocation7 + $0x20] ss:$8 sps:$4 sm:$0xff]  }
  0x64   : > { %482 = vmatpush1.bf16.msra.mxu0 %v1543_v4  ;;  %729 = vmatpush1.bf16.msra.mxu1 %v1564_v11  ;;  %v1570_v18 = vld [vmem:[#allocation8 + $0x50] ss:$8 sps:$4 sm:$0xff]   ;;  %v1571_v19 = vld [vmem:[#allocation8 + $0x44] ss:$8 sps:$4 sm:$0xff]   ;;  %v1556_v20 = vld [vmem:[#allocation7 + $0x14] ss:$8 sps:$4 sm:$0xff]  }
  0x65   : > { %483 = vmatprep.subr.bf16.mxu0 %v1544_v5  ;;  %730 = vmatprep.subr.bf16.mxu1 %v1565_v12  ;;  %v1558_v21 = vld [vmem:[#allocation7 + $0x10] ss:$8 sps:$4 sm:$0xff]   ;;  %v1573_v22 = vld [vmem:[#allocation8 + $0x40] ss:$8 sps:$4 sm:$0xff]   ;;  %v1574_v23 = vld [vmem:[#allocation8 + $0x34] ss:$8 sps:$4 sm:$0xff]  }
  0x66   : > { %v1559_v24 = vld [vmem:[#allocation7 + $0x4] ss:$8 sps:$4 sm:$0xff]   ;;  %v1561_v25 = vld [vmem:[#allocation7] ss:$8 sps:$4 sm:$0xff]   ;;  %v1576_v27 = vld [vmem:[#allocation8 + $0x30] ss:$8 sps:$4 sm:$0xff]  }
  0x67   : > { %v1577_v28 = vld [vmem:[#allocation8 + $0x24] ss:$8 sps:$4 sm:$0xff]   ;;  %v1579_v29 = vld [vmem:[#allocation8 + $0x20] ss:$8 sps:$4 sm:$0xff]   ;;  %v1580_v31 = vld [vmem:[#allocation8 + $0x14] ss:$8 sps:$4 sm:$0xff]  }
  0x68   : > { %484 = vmatpush1.bf16.msra.mxu0 %v1546_v6  ;;  %731 = vmatpush1.bf16.msra.mxu1 %v1567_v14  ;;  %v1582_v32 = vld [vmem:[#allocation8 + $0x10] ss:$8 sps:$4 sm:$0xff]   ;;  %v1583_v33 = vld [vmem:[#allocation8 + $0x4] ss:$8 sps:$4 sm:$0xff]   ;;  %v1585_v34 = vld [vmem:[#allocation8] ss:$8 sps:$4 sm:$0xff]  }
  0x69   : > { %485 = vmatprep.subr.bf16.mxu0 %v1547_v7  ;;  %732 = vmatprep.subr.bf16.mxu1 %v1568_v15  ;;  %v1586_v35 = vld [vmem:[#allocation8 + $0xf4] ss:$8 sps:$4 sm:$0xff]   ;;  %v1588_v36 = vld [vmem:[#allocation8 + $0xf0] ss:$8 sps:$4 sm:$0xff]   ;;  %v1589_v37 = vld [vmem:[#allocation8 + $0xe4] ss:$8 sps:$4 sm:$0xff]  }
  0x6a   : > { %v1591_v38 = vld [vmem:[#allocation8 + $0xe0] ss:$8 sps:$4 sm:$0xff]   ;;  %v1592_v39 = vld [vmem:[#allocation8 + $0xd4] ss:$8 sps:$4 sm:$0xff]   ;;  %v1594_v40 = vld [vmem:[#allocation8 + $0xd0] ss:$8 sps:$4 sm:$0xff]  }
  0x6b   : > { %v1595_v41 = vld [vmem:[#allocation8 + $0xc4] ss:$8 sps:$4 sm:$0xff]   ;;  %v1597_v42 = vld [vmem:[#allocation8 + $0xc0] ss:$8 sps:$4 sm:$0xff]   ;;  %v1598_v43 = vld [vmem:[#allocation8 + $0xb4] ss:$8 sps:$4 sm:$0xff]  }
  0x6c   : > { %486 = vmatpush1.bf16.msra.mxu0 %v1549_v8  ;;  %733 = vmatpush1.bf16.msra.mxu1 %v1570_v18  ;;  %v1600_v44 = vld [vmem:[#allocation8 + $0xb0] ss:$8 sps:$4 sm:$0xff]   ;;  %v1601_v45 = vld [vmem:[#allocation8 + $0xa4] ss:$8 sps:$4 sm:$0xff]   ;;  %v1603_v46 = vld [vmem:[#allocation8 + $0xa0] ss:$8 sps:$4 sm:$0xff]  }
  0x6d   : > { %487 = vmatprep.subr.bf16.mxu0 %v1550_v9  ;;  %734 = vmatprep.subr.bf16.mxu1 %v1571_v19  ;;  %v1604_v47 = vld [vmem:[#allocation8 + $0x94] ss:$8 sps:$4 sm:$0xff]   ;;  %v1606_v48 = vld [vmem:[#allocation8 + $0x90] ss:$8 sps:$4 sm:$0xff]   ;;  %v1607_v49 = vld [vmem:[#allocation8 + $0x84] ss:$8 sps:$4 sm:$0xff]  }
  0x6e   : > { %v1609_v50 = vld [vmem:[#allocation8 + $0x80] ss:$8 sps:$4 sm:$0xff]   ;;  %v390_v52 = vshrl.u32 %v389_v51, 7 }
  0x6f   : > { %v387_v54 = vld [vmem:[%s2128_s3] sm:$0x3] }
  0x70   : > { %488 = vmatpush1.bf16.msra.mxu0 %v1552_v13  ;;  %735 = vmatpush1.bf16.msra.mxu1 %v1573_v22  ;;  %v391_v53 = vsub.s32 0, %v390_v52  ;;  %v395_v55 = vsub.s32 1, %v390_v52  ;;  %v556_v4 = vld [vmem:[%s2130_s5] sm:$0x3] }
  0x71   : > { %489 = vmatprep.subr.bf16.mxu0 %v1553_v16  ;;  %736 = vmatprep.subr.bf16.mxu1 %v1574_v23 }
  0x72   : > { %v392_v56 = vrot.slane %v387_v54, %v391_v53  ;;  %v396_v57 = vrot.slane %v387_v54, %v395_v55  ;;  %v561_v5 = vrot.slane %v556_v4, %v391_v53  ;;  %v565_v6 = vrot.slane %v556_v4, %v395_v55 }
  0x74   : > { %490 = vmatpush1.bf16.msra.mxu0 %v1555_v17  ;;  %737 = vmatpush1.bf16.msra.mxu1 %v1576_v27 }
  0x75   : > { %491 = vmatprep.subr.bf16.mxu0 %v1556_v20  ;;  %738 = vmatprep.subr.bf16.mxu1 %v1577_v28 }
  0x78   : > { %492 = vmatpush1.bf16.msra.mxu0 %v1558_v21  ;;  %739 = vmatpush1.bf16.msra.mxu1 %v1579_v29 }
  0x79   : > { %493 = vmatprep.subr.bf16.mxu0 %v1559_v24  ;;  %740 = vmatprep.subr.bf16.mxu1 %v1580_v31 }
  0x7c   : > { %494 = vmatpush1.bf16.msra.mxu0 %v1561_v25  ;;  %741 = vmatpush1.bf16.msra.mxu1 %v1582_v32 }
  0x7d   : > { %742 = vmatprep.subr.bf16.mxu1 %v1583_v33 }
  0x7f   : > { %512 = vmatmul.mubr.bf16.vlgmr.msra.gmra.mxu0 %v370_v30 }
  0x80   : > { %743 = vmatpush1.bf16.msra.mxu1 %v1585_v34 }
  0x81   : > { %744 = vmatprep.subr.bf16.mxu1 %v1586_v35 }
  0x84   : > { %745 = vmatpush2.bf16.msra.mxu1 %v1588_v36 }
  0x85   : > { %746 = vmatprep.subr.bf16.mxu1 %v1589_v37 }
  0x88   : > { %747 = vmatpush2.bf16.msra.mxu1 %v1591_v38 }
  0x89   : > { %748 = vmatprep.subr.bf16.mxu1 %v1592_v39 }
  0x8c   : > { %749 = vmatpush2.bf16.msra.mxu1 %v1594_v40 }
  0x8d   : > { %750 = vmatprep.subr.bf16.mxu1 %v1595_v41 }
  0x90   : > { %751 = vmatpush2.bf16.msra.mxu1 %v1597_v42 }
  0x91   : > { %752 = vmatprep.subr.bf16.mxu1 %v1598_v43 }
  0x94   : > { %753 = vmatpush2.bf16.msra.mxu1 %v1600_v44 }
  0x95   : > { %754 = vmatprep.subr.bf16.mxu1 %v1601_v45 }
  0x98   : > { %755 = vmatpush2.bf16.msra.mxu1 %v1603_v46 }
  0x99   : > { %756 = vmatprep.subr.bf16.mxu1 %v1604_v47 }
  0x9c   : > { %757 = vmatpush2.bf16.msra.mxu1 %v1606_v48 }
  0x9d   : > { %758 = vmatprep.subr.bf16.mxu1 %v1607_v49 }
  0xa0   : > { %759 = vmatpush2.bf16.msra.mxu1 %v1609_v50 }
 0x13f   : > { %v513_v58 = vpop.f32.mrf.mxu0 }
 0x140   : > { %v514_v59 = vadd.f32 %v513_v58, %v392_v56 }
 0x141   : > { %v515_v60 = vpop.f32.mrf.mxu0 }
 0x142   : > { %v516_v61 = vadd.f32 %v515_v60, %v396_v57  ;;  %v520_v62 = vmax.f32 %v514_v59, 0.0 }
 0x143   : > { %v517_v63 = vpop.f32.mrf.mxu0 }
 0x144   : > { %v521_v0 = vmax.f32 %v516_v61, 0.0  ;;  %v522_v3 = vpack.c.bf16 %v520_v62, %v520_v62 }
 0x145   : > { %v518_v1 = vpop.f32.mrf.mxu0 }
 0x146   : > { %v523_v2 = vpack.c.bf16 %v521_v0, %v521_v0 }
 0x148   : > { %760 = vmatprep.mubr.bf16.mxu1 %v523_v2 }
 0x149   : > { %761 = vmatmul.mubr.bf16.vlgmr.msra.gmra.mxu1 %v522_v3 }
 0x209   : > { %v762_v7 = vpop.f32.mrf.mxu1 }
 0x20a   : > { %v763_v8 = vadd.f32 %v762_v7, %v561_v5 }
 0x20b   : > { %v764_v9 = vpop.f32.mrf.mxu1 }
 0x20c   : > { %v769_v10 = vmax.f32 %v763_v8, 0.0  ;;  %v765_v11 = vadd.f32 %v764_v9, %v565_v6 }
 0x20d   : > { %v766_v12 = vpop.f32.mrf.mxu1 }
 0x20e   : > { %771 = vst [vmem:[%s2063_s28] sm:$0xff] %v769_v10  ;;  %v770_v13 = vmax.f32 %v765_v11, 0.0 }
 0x20f   : > { %v767_v14 = vpop.f32.mrf.mxu1 }
 0x210   : > { %772 = vst [vmem:[%s2063_s28 + $0x8] sm:$0xff] %v770_v13 }
 0x211 PF: > { %p1381_p5 = scmp.ne.s32.totalorder %s1870_s24, 1 }
 0x213   : > { %776 = sbr.rel (%p1381_p5) target bundleno = 971 (0x3cb), region = 68 }
 0x218   : > { %v1610_v15 = vld [vmem:[#allocation7 + $0x74] ss:$8 sps:$4 sm:$0xff]   ;;  %v1612_v16 = vld [vmem:[#allocation7 + $0x70] ss:$8 sps:$4 sm:$0xff]   ;;  %v1887_v17 = vmov 0   ;;  %v797_v2 = vlaneseq }
 0x219   : > { %919 = vmatprep.mubr.bf16.mxu0 %v1887_v17  ;;  %887 = vmatprep.subr.bf16.mxu0 %v1610_v15  ;;  %v1613_v18 = vld [vmem:[#allocation7 + $0x64] ss:$8 sps:$4 sm:$0xff]   ;;  %v1615_v19 = vld [vmem:[#allocation7 + $0x60] ss:$8 sps:$4 sm:$0xff]   ;;  %v1616_v20 = vld [vmem:[#allocation7 + $0x54] ss:$8 sps:$4 sm:$0xff]  }
 0x21a   : > { %888 = vmatpush1.bf16.msra.mxu0 %v1612_v16  ;;  %v1618_v21 = vld [vmem:[#allocation7 + $0x50] ss:$8 sps:$4 sm:$0xff]   ;;  %v1619_v22 = vld [vmem:[#allocation7 + $0x44] ss:$8 sps:$4 sm:$0xff]   ;;  %v1621_v23 = vld [vmem:[#allocation7 + $0x40] ss:$8 sps:$4 sm:$0xff]  }
 0x21b   : > { %889 = vmatprep.subr.bf16.mxu0 %v1613_v18  ;;  %v1622_v24 = vld [vmem:[#allocation7 + $0x34] ss:$8 sps:$4 sm:$0xff]   ;;  %v1636_v26 = vld [vmem:[#allocation8 + $0x70] ss:$8 sps:$4 sm:$0xff]   ;;  %v1637_v27 = vld [vmem:[#allocation8 + $0x64] ss:$8 sps:$4 sm:$0xff]  }
 0x21c   : > { %v1634_v25 = vld [vmem:[#allocation8 + $0x74] ss:$8 sps:$4 sm:$0xff]   ;;  %v1624_v28 = vld [vmem:[#allocation7 + $0x30] ss:$8 sps:$4 sm:$0xff]   ;;  %v1639_v29 = vld [vmem:[#allocation8 + $0x60] ss:$8 sps:$4 sm:$0xff]  }
 0x21d   : > { %1136 = vmatprep.subr.bf16.mxu1 %v1634_v25  ;;  %v1640_v30 = vld [vmem:[#allocation8 + $0x54] ss:$8 sps:$4 sm:$0xff]   ;;  %v1625_v31 = vld [vmem:[#allocation7 + $0x24] ss:$8 sps:$4 sm:$0xff]   ;;  %v1627_v32 = vld [vmem:[#allocation7 + $0x20] ss:$8 sps:$4 sm:$0xff]  }
 0x21e   : > { %890 = vmatpush1.bf16.msra.mxu0 %v1615_v19  ;;  %1137 = vmatpush1.bf16.msra.mxu1 %v1636_v26  ;;  %v1642_v33 = vld [vmem:[#allocation8 + $0x50] ss:$8 sps:$4 sm:$0xff]   ;;  %v1643_v34 = vld [vmem:[#allocation8 + $0x44] ss:$8 sps:$4 sm:$0xff]   ;;  %v1628_v35 = vld [vmem:[#allocation7 + $0x14] ss:$8 sps:$4 sm:$0xff]  }
 0x21f   : > { %891 = vmatprep.subr.bf16.mxu0 %v1616_v20  ;;  %1138 = vmatprep.subr.bf16.mxu1 %v1637_v27  ;;  %v1630_v36 = vld [vmem:[#allocation7 + $0x10] ss:$8 sps:$4 sm:$0xff]   ;;  %v1645_v37 = vld [vmem:[#allocation8 + $0x40] ss:$8 sps:$4 sm:$0xff]   ;;  %v1646_v38 = vld [vmem:[#allocation8 + $0x34] ss:$8 sps:$4 sm:$0xff]  }
 0x220   : > { %v1631_v39 = vld [vmem:[#allocation7 + $0x4] ss:$8 sps:$4 sm:$0xff]   ;;  %v1633_v40 = vld [vmem:[#allocation7] ss:$8 sps:$4 sm:$0xff]   ;;  %v777_v41 = vld [vmem:[#allocation5] sm:$0xff]  ;;  %v798_v3 = vshrl.u32 %v797_v2, 7 }
 0x221   : > { %v1648_v42 = vld [vmem:[#allocation8 + $0x30] ss:$8 sps:$4 sm:$0xff]   ;;  %v1649_v43 = vld [vmem:[#allocation8 + $0x24] ss:$8 sps:$4 sm:$0xff]   ;;  %v1651_v44 = vld [vmem:[#allocation8 + $0x20] ss:$8 sps:$4 sm:$0xff]   ;;  %v778_v45 = vpack.c.bf16 %v777_v41, %v777_v41 }
 0x222   : > { %892 = vmatpush1.bf16.msra.mxu0 %v1618_v21  ;;  %1139 = vmatpush1.bf16.msra.mxu1 %v1639_v29  ;;  %v1652_v46 = vld [vmem:[#allocation8 + $0x14] ss:$8 sps:$4 sm:$0xff]   ;;  %v1654_v47 = vld [vmem:[#allocation8 + $0x10] ss:$8 sps:$4 sm:$0xff]   ;;  %v1655_v48 = vld [vmem:[#allocation8 + $0x4] ss:$8 sps:$4 sm:$0xff]  }
 0x223   : > { %893 = vmatprep.subr.bf16.mxu0 %v1619_v22  ;;  %1140 = vmatprep.subr.bf16.mxu1 %v1640_v30  ;;  %v1657_v49 = vld [vmem:[#allocation8] ss:$8 sps:$4 sm:$0xff]   ;;  %v1658_v50 = vld [vmem:[#allocation8 + $0xf4] ss:$8 sps:$4 sm:$0xff]   ;;  %v1660_v51 = vld [vmem:[#allocation8 + $0xf0] ss:$8 sps:$4 sm:$0xff]  }
 0x224   : > { %v1661_v52 = vld [vmem:[#allocation8 + $0xe4] ss:$8 sps:$4 sm:$0xff]   ;;  %v1663_v53 = vld [vmem:[#allocation8 + $0xe0] ss:$8 sps:$4 sm:$0xff]   ;;  %v1664_v54 = vld [vmem:[#allocation8 + $0xd4] ss:$8 sps:$4 sm:$0xff]  }
 0x225   : > { %v1666_v55 = vld [vmem:[#allocation8 + $0xd0] ss:$8 sps:$4 sm:$0xff]   ;;  %v1667_v56 = vld [vmem:[#allocation8 + $0xc4] ss:$8 sps:$4 sm:$0xff]   ;;  %v1669_v57 = vld [vmem:[#allocation8 + $0xc0] ss:$8 sps:$4 sm:$0xff]  }
 0x226   : > { %894 = vmatpush1.bf16.msra.mxu0 %v1621_v23  ;;  %1141 = vmatpush1.bf16.msra.mxu1 %v1642_v33  ;;  %v1670_v58 = vld [vmem:[#allocation8 + $0xb4] ss:$8 sps:$4 sm:$0xff]   ;;  %v1672_v59 = vld [vmem:[#allocation8 + $0xb0] ss:$8 sps:$4 sm:$0xff]   ;;  %v1673_v60 = vld [vmem:[#allocation8 + $0xa4] ss:$8 sps:$4 sm:$0xff]  }
 0x227   : > { %895 = vmatprep.subr.bf16.mxu0 %v1622_v24  ;;  %1142 = vmatprep.subr.bf16.mxu1 %v1643_v34  ;;  %v1675_v61 = vld [vmem:[#allocation8 + $0xa0] ss:$8 sps:$4 sm:$0xff]   ;;  %v1676_v62 = vld [vmem:[#allocation8 + $0x94] ss:$8 sps:$4 sm:$0xff]   ;;  %v1678_v63 = vld [vmem:[#allocation8 + $0x90] ss:$8 sps:$4 sm:$0xff]  }
 0x228   : > { %v1679_v0 = vld [vmem:[#allocation8 + $0x84] ss:$8 sps:$4 sm:$0xff]   ;;  %v1681_v1 = vld [vmem:[#allocation8 + $0x80] ss:$8 sps:$4 sm:$0xff]   ;;  %v799_v4 = vsub.s32 0, %v798_v3  ;;  %v803_v6 = vsub.s32 1, %v798_v3 }
 0x229   : > { %v795_v5 = vld [vmem:[%s2128_s3] sm:$0x3] }
 0x22a   : > { %896 = vmatpush1.bf16.msra.mxu0 %v1624_v28  ;;  %1143 = vmatpush1.bf16.msra.mxu1 %v1645_v37  ;;  %v800_v7 = vrot.slane %v795_v5, %v799_v4  ;;  %v804_v8 = vrot.slane %v795_v5, %v803_v6  ;;  %v964_v19 = vld [vmem:[%s2130_s5] sm:$0x3] }
 0x22b   : > { %897 = vmatprep.subr.bf16.mxu0 %v1625_v31  ;;  %1144 = vmatprep.subr.bf16.mxu1 %v1646_v38  ;;  %v969_v20 = vrot.slane %v964_v19, %v799_v4  ;;  %v973_v21 = vrot.slane %v964_v19, %v803_v6 }
 0x22e   : > { %898 = vmatpush1.bf16.msra.mxu0 %v1627_v32  ;;  %1145 = vmatpush1.bf16.msra.mxu1 %v1648_v42 }
 0x22f   : > { %899 = vmatprep.subr.bf16.mxu0 %v1628_v35  ;;  %1146 = vmatprep.subr.bf16.mxu1 %v1649_v43 }
 0x232   : > { %900 = vmatpush1.bf16.msra.mxu0 %v1630_v36  ;;  %1147 = vmatpush1.bf16.msra.mxu1 %v1651_v44 }
 0x233   : > { %901 = vmatprep.subr.bf16.mxu0 %v1631_v39  ;;  %1148 = vmatprep.subr.bf16.mxu1 %v1652_v46 }
 0x236   : > { %902 = vmatpush1.bf16.msra.mxu0 %v1633_v40  ;;  %1149 = vmatpush1.bf16.msra.mxu1 %v1654_v47 }
 0x237   : > { %1150 = vmatprep.subr.bf16.mxu1 %v1655_v48 }
 0x239   : > { %920 = vmatmul.mubr.bf16.vlgmr.msra.gmra.mxu0 %v778_v45 }
 0x23a   : > { %1151 = vmatpush1.bf16.msra.mxu1 %v1657_v49 }
 0x23b   : > { %1152 = vmatprep.subr.bf16.mxu1 %v1658_v50 }
 0x23e   : > { %1153 = vmatpush2.bf16.msra.mxu1 %v1660_v51 }
 0x23f   : > { %1154 = vmatprep.subr.bf16.mxu1 %v1661_v52 }
 0x242   : > { %1155 = vmatpush2.bf16.msra.mxu1 %v1663_v53 }
 0x243   : > { %1156 = vmatprep.subr.bf16.mxu1 %v1664_v54 }
 0x246   : > { %1157 = vmatpush2.bf16.msra.mxu1 %v1666_v55 }
 0x247   : > { %1158 = vmatprep.subr.bf16.mxu1 %v1667_v56 }
 0x24a   : > { %1159 = vmatpush2.bf16.msra.mxu1 %v1669_v57 }
 0x24b   : > { %1160 = vmatprep.subr.bf16.mxu1 %v1670_v58 }
 0x24e   : > { %1161 = vmatpush2.bf16.msra.mxu1 %v1672_v59 }
 0x24f   : > { %1162 = vmatprep.subr.bf16.mxu1 %v1673_v60 }
 0x252   : > { %1163 = vmatpush2.bf16.msra.mxu1 %v1675_v61 }
 0x253   : > { %1164 = vmatprep.subr.bf16.mxu1 %v1676_v62 }
 0x256   : > { %1165 = vmatpush2.bf16.msra.mxu1 %v1678_v63 }
 0x257   : > { %1166 = vmatprep.subr.bf16.mxu1 %v1679_v0 }
 0x25a   : > { %1167 = vmatpush2.bf16.msra.mxu1 %v1681_v1 }
 0x2f9   : > { %v921_v9 = vpop.f32.mrf.mxu0 }
 0x2fa   : > { %v922_v10 = vadd.f32 %v921_v9, %v800_v7 }
 0x2fb   : > { %v923_v11 = vpop.f32.mrf.mxu0 }
 0x2fc   : > { %v924_v12 = vadd.f32 %v923_v11, %v804_v8  ;;  %v928_v13 = vmax.f32 %v922_v10, 0.0 }
 0x2fd   : > { %v925_v14 = vpop.f32.mrf.mxu0 }
 0x2fe   : > { %v929_v15 = vmax.f32 %v924_v12, 0.0  ;;  %v930_v18 = vpack.c.bf16 %v928_v13, %v928_v13 }
 0x2ff   : > { %v926_v16 = vpop.f32.mrf.mxu0 }
 0x300   : > { %v931_v17 = vpack.c.bf16 %v929_v15, %v929_v15 }
 0x302   : > { %1168 = vmatprep.mubr.bf16.mxu1 %v931_v17 }
 0x303   : > { %1169 = vmatmul.mubr.bf16.vlgmr.msra.gmra.mxu1 %v930_v18 }
 0x3c3   : > { %v1170_v22 = vpop.f32.mrf.mxu1 }
 0x3c4   : > { %v1171_v23 = vadd.f32 %v1170_v22, %v969_v20 }
 0x3c5   : > { %v1172_v24 = vpop.f32.mrf.mxu1 }
 0x3c6   : > { %v1177_v25 = vmax.f32 %v1171_v23, 0.0  ;;  %v1173_v26 = vadd.f32 %v1172_v24, %v973_v21 }
 0x3c7   : > { %v1174_v27 = vpop.f32.mrf.mxu1 }
 0x3c8   : > { %1179 = vst [vmem:[%s2063_s28] sm:$0xff] %v1177_v25  ;;  %v1178_v28 = vmax.f32 %v1173_v26, 0.0 }
 0x3c9   : > { %v1175_v29 = vpop.f32.mrf.mxu1 }
 0x3ca   : > { %1180 = vst [vmem:[%s2063_s28 + $0x8] sm:$0xff] %v1178_v28 }
 0x3cb PF: > { %s1435_s30 = sshll.u32 %s1870_s24, 8  ;;  %s1197_s27 = sshll.u32 %s2063_s28, 4  ;;  %s1198_s27 = int_to_ptr.vmem [resolvable:$true] %s1197_s27 }
 0x3cc   : > { %s1195_s20 = scalar_lea.hbm %s2131_s6, %s1435_s30  ;;  %s1182_s16 = scalar_lea.sflag [#allocation4], %s356_s11 }
 0x3cd   : > { %s1786_s18 = scalar_lea.vmem %s1198_s27, 256  ;;  %s1888_s19 = smov [#allocation10]  }
 0x3ce   : > { %p1787_p6 = scmp.ne.s32.totalorder %s1198_s27, %s1786_s18  ;;  %s1790_s8 = sshll.u32 %s1888_s19, 4  ;;  %s1791_s8 = int_to_ptr.vmem [resolvable:$false] %s1790_s8 }
 0x3cf   : > { %s1792_s12 = scalar_lea.vmem %s1791_s8, 512  ;;  %p1793_p2 = scmp.lt.s32.totalorder %s1198_s27, %s1791_s8 }
 0x3d0   : > { %p1788_p7 = pnand %p1787_p6, %p1967_p4  ;;  %p1794_p11 = scmp.lt.s32.totalorder %s1792_s12, %s1786_s18 }
 0x3d2   : > { %p1789_p9 = pneg %p1788_p7  ;;  %p1795_p0 = por %p1794_p11, %p1793_p2 }
 0x3d4   : > { %p1796_p1 = pnand %p1795_p0, %p1789_p9 }
 0x3d6   : > { %1799 = shalt.err (!%p1796_p1)
}
 0x3d7   : > { %s1800_s24 = scalar_lea.hbm %s1195_s20, 256  ;;  %s1804_s13 = scalar_lea.hbm %s2131_s6, 512 }
 0x3d8   : > { %p1801_p10 = scmp.ne.s32.totalorder %s1195_s20, %s1800_s24  ;;  %p1805_p13 = scmp.lt.s32.totalorder %s1195_s20, %s2131_s6 }
 0x3d9   : > { %p1806_p5 = scmp.lt.s32.totalorder %s1804_s13, %s1800_s24 }
 0x3da   : > { %p1802_p12 = pnand %p1801_p10, %p1967_p4 }
 0x3db   : > { %p1807_p6 = por %p1806_p5, %p1805_p13 }
 0x3dc   : > { %p1803_p3 = pneg %p1802_p12 }
 0x3de   : > { %p1808_p7 = pnand %p1807_p6, %p1803_p3 }
 0x3e0   : > { %1811 = shalt.err (!%p1808_p7)
}
 0x3e1   : > { %1452 = dma.vmem_to_hbm [thread:$0]  (%p1967_p4), %s1198_s27, 256, %s1195_s20, %s1182_s16  }
 0x3e2 PF: > { %s1209_s15 = sand.u32 1, %s1858_s21   ;;  %p2146_p9 = scmp.ge.s32.totalorder %s1878_s26, 2 }
 0x3e3   : > { %s1210_s17 = scalar_lea.sflag [#allocation4], %s1209_s15 }
 0x3e4   : > { %p1469_p2 = pnand %p2146_p9, %p1974_p8 }
 0x3e6   : > { %p1470_p11 = pneg %p1469_p2 }
 0x3e8   : > { %1853 = dma.done.wait (%p1470_p11), %s1210_s17, 256  }
 0x3e9   : > { %1855 = vsyncadd (%p1470_p11), %s1210_s17, 4294967040  ;;  %s26_s26 = sadd.s32 1, %s1878_s26   ;;  %s2147_s21 = smov %s1862_s22 }
 0x3ea   : > { %p23_p0 = scmp.ge.s32.totalorder %s26_s26, 4   ;;  %s2148_s22 = smov %s1866_s23 }
 0x3eb   : > { %s2149_s23 = smov %s1980_s10  ;;  %s2150_s24 = smov %s1874_s25 }
 0x3ec   : > { %s2151_s25 = smov %s2153_s29  ;;  %25 = sbr.rel (!%p23_p0) target bundleno = 9 (0x9), region = 118 }
 0x3f1   :  { %1215 = vsyncpa [#allocation3], 1 }
 0x3f2   :  { %1217 = vsyncpa [#allocation3 + $0x1], 1 }
 0x3f3   :  { %1218 = vsyncpa [#allocation6], 1 }
 0x3f4   :  { %1220 = vsyncpa [#allocation6 + $0x1], 1 }
 0x3f5   :  { %1221 = vsyncpa [#allocation9], 1 }
 0x3f6   :  { %1222 = vsyncpa [#allocation4], 1 }
 0x3f7   :  { %1224 = vsyncpa [#allocation4 + $0x1], 1 }

</bundles_post_ra>
